<compile_context>
chip_gen: v7x
topology: tpu7x:2x2x1
jax: 0.10.0
libtpu: 0.0.40
codegen_flags: <defaults>
</compile_context>

<pallas_src>
import numpy as np
import jax
import jax.numpy as jnp
from jax import lax
from jax.experimental import pallas as pl
from jax.experimental.pallas import tpu as pltpu

NEG_SLOPE = 0.01  # torch.nn.LeakyReLU() default negative_slope


def _leaky(v):
    return jnp.where(v >= 0, v, NEG_SLOPE * v)


def _nearest_upsample_matrix(l_in, t_out):
    """U[l, t] = 1 iff nn.Upsample(mode='nearest') maps output index t to input l."""
    src = np.minimum((np.arange(t_out) * l_in) // t_out, l_in - 1)
    u = np.zeros((l_in, t_out), np.float32)
    u[src, np.arange(t_out)] = 1.0
    return u


def _make_kernel(dilations, filters, has_res, kernel_size, T, bs):
    K = kernel_size
    L = bs * T

    def conv(h, w_ref, b_ref, c_in, dilation, t_local):
        acc = None
        for k in range(K):
            s = (K - 1 - k) * dilation                  # causal left shift of this tap
            wk = w_ref[k]                               # (c_out, c_in)
            if s == 0:
                hk = h
            else:
                hk = jnp.where(t_local >= s, pltpu.roll(h, shift=s, axis=1), 0.0)
            if c_in == 1:
                contrib = wk * hk                       # (c_out,1)*(1,L) -> (c_out,L)
            else:
                contrib = jnp.dot(wk, hk, preferred_element_type=jnp.float32)
            acc = contrib if acc is None else acc + contrib
        return acc + b_ref[...]

    def pointwise(h, w_ref, b_ref, c_in):
        w = w_ref[...]                                  # (c_out, c_in)
        out = w * h if c_in == 1 else jnp.dot(w, h, preferred_element_type=jnp.float32)
        return out + b_ref[...]

    def kernel(x_ref, sel_ref, *refs):
        o_ref = refs[-1]
        prefs = list(refs[:-1])

        # Nearest upsample: (1, bs*L_in) @ (bs*L_in, bs*T) -> (1, bs*T)
        x = x_ref[0]
        h = jnp.dot(x, sel_ref[...], preferred_element_type=jnp.float32)

        # Per-lane local (within-sample) time index, hoisted once.
        t_local = lax.broadcasted_iota(jnp.int32, (1, L), 1) % T

        idx = 0
        c_in = 1
        for d, c_out, res in zip(dilations, filters, has_res):
            w1, b1, w2, b2 = prefs[idx:idx + 4]
            idx += 4
            h_in = h
            h = _leaky(conv(h_in, w1, b1, c_in, d, t_local))
            h = _leaky(conv(h, w2, b2, c_out, d, t_local))
            if res:
                wr, br = prefs[idx:idx + 2]
                idx += 2
                shortcut = pointwise(h_in, wr, br, c_in)
            else:
                shortcut = h_in
            h = _leaky(h + shortcut)                    # activation after residual add
            c_in = c_out

        o_ref[...] = h[None, :, :]                      # (1, C_final, bs*T)

    return kernel


def rec_head_forward(x, params, cfg):
    """x: (N, L_in) f32 -> (N, in_channels, input_length) f32."""
    N, l_in = x.shape
    T = cfg["input_length"]
    K = cfg["kernel_size"]
    dilations = cfg["dilations"]
    filters = cfg["filters"]
    out_ch = filters[-1]

    # Samples per grid step: largest divisor of N keeping lanes (bs*T) <= 4096.
    bs = max(d for d in range(1, N + 1) if N % d == 0 and d * T <= 4096)
    G = N // bs
    L = bs * T

    # Host-side (loop-invariant) precompute: upsample selection matrix and
    # weight re-layout.
    sel = jnp.asarray(np.kron(np.eye(bs, dtype=np.float32),
                              _nearest_upsample_matrix(l_in, T)))  # (bs*L_in, bs*T)
    x_resh = x.reshape(G, 1, bs * l_in)

    flat_inputs = [x_resh, sel]
    in_specs = [
        pl.BlockSpec((1, 1, bs * l_in), lambda g: (g, 0, 0)),
        pl.BlockSpec((bs * l_in, L), lambda g: (0, 0)),
    ]

    def add_input(a):
        flat_inputs.append(a)
        in_specs.append(pl.BlockSpec(a.shape, lambda g, nd=a.ndim: (0,) * nd))

    has_res = []
    c_in = 1
    for p, c_out in zip(params, filters):
        add_input(jnp.transpose(p["w1"], (2, 0, 1)))   # (K, c_out, c_in)
        add_input(p["b1"].reshape(c_out, 1))
        add_input(jnp.transpose(p["w2"], (2, 0, 1)))   # (K, c_out, c_out)
        add_input(p["b2"].reshape(c_out, 1))
        res = c_in != c_out
        has_res.append(res)
        if res:
            add_input(p["wr"][:, :, 0])                # (c_out, c_in) 1x1 shortcut
            add_input(p["br"].reshape(c_out, 1))
        c_in = c_out

    kernel = _make_kernel(dilations, filters, has_res, K, T, bs)

    out = pl.pallas_call(
        kernel,
        out_shape=jax.ShapeDtypeStruct((G, out_ch, L), jnp.float32),
        grid_spec=pltpu.PrefetchScalarGridSpec(
            num_scalar_prefetch=0,
            grid=(G,),
            in_specs=in_specs,
            out_specs=pl.BlockSpec((1, out_ch, L), lambda g: (g, 0, 0)),
        ),
        compiler_params=pltpu.CompilerParams(
            dimension_semantics=("parallel",)),
    )(*flat_inputs)

    # (G, C, bs*T) -> (N, C, T)
    return (out.reshape(G, out_ch, bs, T)
               .transpose(0, 2, 1, 3)
               .reshape(N, out_ch, T))


# ---------------- pure-JAX reference (faithful to the PyTorch forward) --------

def _causal_conv_ref(h, w, b, d):
    # h: (N, C_in, T), w: (C_out, C_in, K) (PyTorch layout), b: (C_out,)
    K = w.shape[-1]
    pad = (K - 1) * d
    hp = jnp.pad(h, ((0, 0), (0, 0), (pad, 0)))
    Tlen = h.shape[-1]
    y = b[:, None]
    for k in range(K):
        y = y + jnp.einsum('oc,nct->not', w[:, :, k], hp[:, :, k * d:k * d + Tlen])
    return y


def rec_head_ref(x, params, cfg):
    N, l_in = x.shape
    T = cfg["input_length"]
    src = np.minimum((np.arange(T) * l_in) // T, l_in - 1)
    h = x[:, src][:, None, :]                           # unsqueeze + nearest upsample
    c_in = 1
    for p, d, c_out in zip(params, cfg["dilations"], cfg["filters"]):
        h_in = h
        h = _leaky(_causal_conv_ref(h_in, p["w1"], p["b1"], d))
        h = _leaky(_causal_conv_ref(h, p["w2"], p["b2"], d))
        if c_in != c_out:
            shortcut = jnp.einsum('oc,nct->not', p["wr"][:, :, 0], h_in) + p["br"][:, None]
        else:
            shortcut = h_in
        h = _leaky(h + shortcut)
        c_in = c_out
    return h


def make_params(key, filters, K):
    params = []
    c_in = 1
    keys = jax.random.split(key, len(filters))
    for kk, c_out in zip(keys, filters):
        k1, k2, k3, k4, k5, k6 = jax.random.split(kk, 6)
        s1 = 1.0 / np.sqrt(c_in * K)
        s2 = 1.0 / np.sqrt(c_out * K)
        p = {
            "w1": jax.random.uniform(k1, (c_out, c_in, K), jnp.float32, -s1, s1),
            "b1": jax.random.uniform(k2, (c_out,), jnp.float32, -s1, s1),
            "w2": jax.random.uniform(k3, (c_out, c_out, K), jnp.float32, -s2, s2),
            "b2": jax.random.uniform(k4, (c_out,), jnp.float32, -s2, s2),
        }
        if c_in != c_out:
            sr = 1.0 / np.sqrt(c_in)
            p["wr"] = jax.random.uniform(k5, (c_out, c_in, 1), jnp.float32, -sr, sr)
            p["br"] = jax.random.uniform(k6, (c_out,), jnp.float32, -sr, sr)
        params.append(p)
        c_in = c_out
    return params


if __name__ == "__main__":
    # RecHead(in_channels=4, kernel_size=3, tcn_channels=8, tcn_layers=2, input_length=32)
    in_channels, kernel_size, tcn_channels, tcn_layers, input_length = 4, 3, 8, 2, 32
    N, L_in = 4, 16                                      # batch, latent length of x

    dilations = sorted([2 ** i for i in range(tcn_layers + 1)], reverse=True)  # [4, 2, 1]
    filters = [tcn_channels] * tcn_layers + [in_channels]                      # [8, 8, 4]
    cfg = dict(input_length=input_length, kernel_size=kernel_size,
               dilations=dilations, filters=filters)

    key = jax.random.PRNGKey(0)
    kx, kp = jax.random.split(key)
    x = jax.random.normal(kx, (N, L_in), jnp.float32)
    params = make_params(kp, filters, kernel_size)

    out = rec_head_forward(x, params, cfg)
    out = jax.block_until_ready(out)

    ref = rec_head_ref(x, params, cfg)
    assert out.shape == (N, in_channels, input_length)
    assert jnp.allclose(out, ref, atol=1e-4, rtol=1e-4), float(jnp.max(jnp.abs(out - ref)))
    print("KERNEL_OK")
</pallas_src>

<mosaic_0001>
module attributes {stable_mosaic.version = 11 : i64} {
  func.func @kernel(%arg0: i32, %arg1: memref<1x1x64xf32, #tpu.memory_space<vmem>>, %arg2: memref<64x128xf32, #tpu.memory_space<vmem>>, %arg3: memref<3x8x1xf32, #tpu.memory_space<vmem>>, %arg4: memref<8x1xf32, #tpu.memory_space<vmem>>, %arg5: memref<3x8x8xf32, #tpu.memory_space<vmem>>, %arg6: memref<8x1xf32, #tpu.memory_space<vmem>>, %arg7: memref<8x1xf32, #tpu.memory_space<vmem>>, %arg8: memref<8x1xf32, #tpu.memory_space<vmem>>, %arg9: memref<3x8x8xf32, #tpu.memory_space<vmem>>, %arg10: memref<8x1xf32, #tpu.memory_space<vmem>>, %arg11: memref<3x8x8xf32, #tpu.memory_space<vmem>>, %arg12: memref<8x1xf32, #tpu.memory_space<vmem>>, %arg13: memref<3x4x8xf32, #tpu.memory_space<vmem>>, %arg14: memref<4x1xf32, #tpu.memory_space<vmem>>, %arg15: memref<3x4x4xf32, #tpu.memory_space<vmem>>, %arg16: memref<4x1xf32, #tpu.memory_space<vmem>>, %arg17: memref<4x8xf32, #tpu.memory_space<vmem>>, %arg18: memref<4x1xf32, #tpu.memory_space<vmem>>, %arg19: memref<1x4x128xf32, #tpu.memory_space<vmem>>) attributes {dimension_semantics = [#tpu.dimension_semantics<parallel>], iteration_bounds = array<i64: 1>, scalar_prefetch = 0 : i64, scratch_operands = 0 : i64, tpu.core_type = #tpu.core_type<tc>, window_params = [{transform_indices = @transform_0, window_bounds = array<i64: 1, 1, 64>}, {pipeline_mode = #tpu.pipeline_mode<synchronous>, transform_indices = @transform_1, window_bounds = array<i64: 64, 128>}, {pipeline_mode = #tpu.pipeline_mode<synchronous>, transform_indices = @transform_2, window_bounds = array<i64: 3, 8, 1>}, {pipeline_mode = #tpu.pipeline_mode<synchronous>, transform_indices = @transform_3, window_bounds = array<i64: 8, 1>}, {pipeline_mode = #tpu.pipeline_mode<synchronous>, transform_indices = @transform_4, window_bounds = array<i64: 3, 8, 8>}, {pipeline_mode = #tpu.pipeline_mode<synchronous>, transform_indices = @transform_5, window_bounds = array<i64: 8, 1>}, {pipeline_mode = #tpu.pipeline_mode<synchronous>, transform_indices = @transform_6, window_bounds = array<i64: 8, 1>}, {pipeline_mode = #tpu.pipeline_mode<synchronous>, transform_indices = @transform_7, window_bounds = array<i64: 8, 1>}, {pipeline_mode = #tpu.pipeline_mode<synchronous>, transform_indices = @transform_8, window_bounds = array<i64: 3, 8, 8>}, {pipeline_mode = #tpu.pipeline_mode<synchronous>, transform_indices = @transform_9, window_bounds = array<i64: 8, 1>}, {pipeline_mode = #tpu.pipeline_mode<synchronous>, transform_indices = @transform_10, window_bounds = array<i64: 3, 8, 8>}, {pipeline_mode = #tpu.pipeline_mode<synchronous>, transform_indices = @transform_11, window_bounds = array<i64: 8, 1>}, {pipeline_mode = #tpu.pipeline_mode<synchronous>, transform_indices = @transform_12, window_bounds = array<i64: 3, 4, 8>}, {pipeline_mode = #tpu.pipeline_mode<synchronous>, transform_indices = @transform_13, window_bounds = array<i64: 4, 1>}, {pipeline_mode = #tpu.pipeline_mode<synchronous>, transform_indices = @transform_14, window_bounds = array<i64: 3, 4, 4>}, {pipeline_mode = #tpu.pipeline_mode<synchronous>, transform_indices = @transform_15, window_bounds = array<i64: 4, 1>}, {pipeline_mode = #tpu.pipeline_mode<synchronous>, transform_indices = @transform_16, window_bounds = array<i64: 4, 8>}, {pipeline_mode = #tpu.pipeline_mode<synchronous>, transform_indices = @transform_17, window_bounds = array<i64: 4, 1>}, {transform_indices = @transform_18, window_bounds = array<i64: 1, 4, 128>}]} {
    %c0 = arith.constant 0 : index
    %c0_0 = arith.constant 0 : index
    %c0_1 = arith.constant 0 : index
    %0 = vector.load %arg1[%c0, %c0_0, %c0_1] : memref<1x1x64xf32, #tpu.memory_space<vmem>>, vector<1x1x64xf32>
    %1 = vector.shape_cast %0 : vector<1x1x64xf32> to vector<1x64xf32>
    %c0_2 = arith.constant 0 : index
    %c0_3 = arith.constant 0 : index
    %2 = vector.load %arg2[%c0_2, %c0_3] : memref<64x128xf32, #tpu.memory_space<vmem>>, vector<64x128xf32>
    %cst = arith.constant dense<0.000000e+00> : vector<1x128xf32>
    %3 = tpu.matmul %1, %2, %cst {dimension_numbers = #tpu.dot_dimension_numbers<[1], [0], [0], [1], [0, 0, 1, 1], [], []>} : vector<1x64xf32>, vector<64x128xf32>, vector<1x128xf32> -> vector<1x128xf32>
    %4 = tpu.iota {dimensions = array<i32: 1>} : vector<1x128xi32>
    %c32_i32 = arith.constant 32 : i32
    %c0_i32 = arith.constant 0 : i32
    %5 = arith.cmpi eq, %c32_i32, %c0_i32 : i32
    %c1_i32 = arith.constant 1 : i32
    %6 = arith.select %5, %c1_i32, %c32_i32 : i32
    %7 = vector.broadcast %6 : i32 to vector<1x128xi32>
    %8 = arith.remsi %4, %7 : vector<1x128xi32>
    %c0_i32_4 = arith.constant 0 : i32
    %9 = vector.broadcast %c0_i32_4 : i32 to vector<1x128xi32>
    %10 = arith.cmpi ne, %8, %9 : vector<1x128xi32>
    %c0_i32_5 = arith.constant 0 : i32
    %11 = vector.broadcast %c0_i32_5 : i32 to vector<1x128xi32>
    %12 = arith.cmpi slt, %8, %11 : vector<1x128xi32>
    %c0_i32_6 = arith.constant 0 : i32
    %13 = arith.cmpi slt, %6, %c0_i32_6 : i32
    %14 = vector.broadcast %13 : i1 to vector<1x128xi1>
    %15 = vector.broadcast %14 : vector<1x128xi1> to vector<1x128xi1>
    %16 = arith.xori %12, %15 : vector<1x128xi1>
    %17 = arith.andi %16, %10 : vector<1x128xi1>
    %18 = vector.broadcast %6 : i32 to vector<1x128xi32>
    %19 = arith.addi %8, %18 : vector<1x128xi32>
    %20 = arith.select %17, %19, %8 : vector<1x128xi1>, vector<1x128xi32>
    %c0_7 = arith.constant 0 : index
    %c0_8 = arith.constant 0 : index
    %c0_9 = arith.constant 0 : index
    %21 = vector.load %arg3[%c0_7, %c0_8, %c0_9] : memref<3x8x1xf32, #tpu.memory_space<vmem>>, vector<1x8x1xf32>
    %22 = vector.shape_cast %21 : vector<1x8x1xf32> to vector<8x1xf32>
    %c8_i32 = arith.constant 8 : i32
    %23 = vector.broadcast %c8_i32 : i32 to vector<1x128xi32>
    %24 = arith.cmpi sge, %20, %23 : vector<1x128xi32>
    %c8_i32_10 = arith.constant 8 : i32
    %25 = tpu.dynamic_rotate %3 by %c8_i32_10 dim 1 : vector<1x128xf32>, i32 -> vector<1x128xf32>
    %cst_11 = arith.constant 0.000000e+00 : f32
    %26 = vector.broadcast %cst_11 : f32 to vector<1x128xf32>
    %27 = arith.select %24, %25, %26 : vector<1x128xi1>, vector<1x128xf32>
    %28 = vector.broadcast %22 : vector<8x1xf32> to vector<8x128xf32>
    %29 = vector.broadcast %27 : vector<1x128xf32> to vector<8x128xf32>
    %30 = arith.mulf %28, %29 : vector<8x128xf32>
    %c1 = arith.constant 1 : index
    %c0_12 = arith.constant 0 : index
    %c0_13 = arith.constant 0 : index
    %31 = vector.load %arg3[%c1, %c0_12, %c0_13] : memref<3x8x1xf32, #tpu.memory_space<vmem>>, vector<1x8x1xf32>
    %32 = vector.shape_cast %31 : vector<1x8x1xf32> to vector<8x1xf32>
    %c4_i32 = arith.constant 4 : i32
    %33 = vector.broadcast %c4_i32 : i32 to vector<1x128xi32>
    %34 = arith.cmpi sge, %20, %33 : vector<1x128xi32>
    %c4_i32_14 = arith.constant 4 : i32
    %35 = tpu.dynamic_rotate %3 by %c4_i32_14 dim 1 : vector<1x128xf32>, i32 -> vector<1x128xf32>
    %cst_15 = arith.constant 0.000000e+00 : f32
    %36 = vector.broadcast %cst_15 : f32 to vector<1x128xf32>
    %37 = arith.select %34, %35, %36 : vector<1x128xi1>, vector<1x128xf32>
    %38 = vector.broadcast %32 : vector<8x1xf32> to vector<8x128xf32>
    %39 = vector.broadcast %37 : vector<1x128xf32> to vector<8x128xf32>
    %40 = arith.mulf %38, %39 : vector<8x128xf32>
    %41 = arith.addf %30, %40 : vector<8x128xf32>
    %c2 = arith.constant 2 : index
    %c0_16 = arith.constant 0 : index
    %c0_17 = arith.constant 0 : index
    %42 = vector.load %arg3[%c2, %c0_16, %c0_17] : memref<3x8x1xf32, #tpu.memory_space<vmem>>, vector<1x8x1xf32>
    %43 = vector.shape_cast %42 : vector<1x8x1xf32> to vector<8x1xf32>
    %44 = vector.broadcast %43 : vector<8x1xf32> to vector<8x128xf32>
    %45 = vector.broadcast %3 : vector<1x128xf32> to vector<8x128xf32>
    %46 = arith.mulf %44, %45 : vector<8x128xf32>
    %47 = arith.addf %41, %46 : vector<8x128xf32>
    %c0_18 = arith.constant 0 : index
    %c0_19 = arith.constant 0 : index
    %48 = vector.load %arg4[%c0_18, %c0_19] : memref<8x1xf32, #tpu.memory_space<vmem>>, vector<8x1xf32>
    %49 = vector.broadcast %48 : vector<8x1xf32> to vector<8x128xf32>
    %50 = arith.addf %47, %49 : vector<8x128xf32>
    %cst_20 = arith.constant 0.000000e+00 : f32
    %51 = vector.broadcast %cst_20 : f32 to vector<8x128xf32>
    %52 = arith.cmpf oge, %50, %51 : vector<8x128xf32>
    %cst_21 = arith.constant 0.00999999977 : f32
    %53 = vector.broadcast %cst_21 : f32 to vector<8x128xf32>
    %54 = arith.mulf %53, %50 : vector<8x128xf32>
    %55 = arith.select %52, %50, %54 : vector<8x128xi1>, vector<8x128xf32>
    %c0_22 = arith.constant 0 : index
    %c0_23 = arith.constant 0 : index
    %c0_24 = arith.constant 0 : index
    %56 = vector.load %arg5[%c0_22, %c0_23, %c0_24] : memref<3x8x8xf32, #tpu.memory_space<vmem>>, vector<1x8x8xf32>
    %57 = vector.shape_cast %56 : vector<1x8x8xf32> to vector<8x8xf32>
    %c8_i32_25 = arith.constant 8 : i32
    %58 = vector.broadcast %c8_i32_25 : i32 to vector<1x128xi32>
    %59 = arith.cmpi sge, %20, %58 : vector<1x128xi32>
    %c8_i32_26 = arith.constant 8 : i32
    %60 = tpu.dynamic_rotate %55 by %c8_i32_26 dim 1 : vector<8x128xf32>, i32 -> vector<8x128xf32>
    %cst_27 = arith.constant 0.000000e+00 : f32
    %61 = vector.shape_cast %59 : vector<1x128xi1> to vector<1x128xi1>
    %62 = vector.broadcast %61 : vector<1x128xi1> to vector<8x128xi1>
    %63 = vector.broadcast %cst_27 : f32 to vector<8x128xf32>
    %64 = arith.select %62, %60, %63 : vector<8x128xi1>, vector<8x128xf32>
    %cst_28 = arith.constant dense<0.000000e+00> : vector<8x128xf32>
    %65 = tpu.matmul %57, %64, %cst_28 {dimension_numbers = #tpu.dot_dimension_numbers<[1], [0], [0], [1], [0, 0, 1, 1], [], []>} : vector<8x8xf32>, vector<8x128xf32>, vector<8x128xf32> -> vector<8x128xf32>
    %c1_29 = arith.constant 1 : index
    %c0_30 = arith.constant 0 : index
    %c0_31 = arith.constant 0 : index
    %66 = vector.load %arg5[%c1_29, %c0_30, %c0_31] : memref<3x8x8xf32, #tpu.memory_space<vmem>>, vector<1x8x8xf32>
    %67 = vector.shape_cast %66 : vector<1x8x8xf32> to vector<8x8xf32>
    %c4_i32_32 = arith.constant 4 : i32
    %68 = vector.broadcast %c4_i32_32 : i32 to vector<1x128xi32>
    %69 = arith.cmpi sge, %20, %68 : vector<1x128xi32>
    %c4_i32_33 = arith.constant 4 : i32
    %70 = tpu.dynamic_rotate %55 by %c4_i32_33 dim 1 : vector<8x128xf32>, i32 -> vector<8x128xf32>
    %cst_34 = arith.constant 0.000000e+00 : f32
    %71 = vector.shape_cast %69 : vector<1x128xi1> to vector<1x128xi1>
    %72 = vector.broadcast %71 : vector<1x128xi1> to vector<8x128xi1>
    %73 = vector.broadcast %cst_34 : f32 to vector<8x128xf32>
    %74 = arith.select %72, %70, %73 : vector<8x128xi1>, vector<8x128xf32>
    %cst_35 = arith.constant dense<0.000000e+00> : vector<8x128xf32>
    %75 = tpu.matmul %67, %74, %cst_35 {dimension_numbers = #tpu.dot_dimension_numbers<[1], [0], [0], [1], [0, 0, 1, 1], [], []>} : vector<8x8xf32>, vector<8x128xf32>, vector<8x128xf32> -> vector<8x128xf32>
    %76 = arith.addf %65, %75 : vector<8x128xf32>
    %c2_36 = arith.constant 2 : index
    %c0_37 = arith.constant 0 : index
    %c0_38 = arith.constant 0 : index
    %77 = vector.load %arg5[%c2_36, %c0_37, %c0_38] : memref<3x8x8xf32, #tpu.memory_space<vmem>>, vector<1x8x8xf32>
    %78 = vector.shape_cast %77 : vector<1x8x8xf32> to vector<8x8xf32>
    %cst_39 = arith.constant dense<0.000000e+00> : vector<8x128xf32>
    %79 = tpu.matmul %78, %55, %cst_39 {dimension_numbers = #tpu.dot_dimension_numbers<[1], [0], [0], [1], [0, 0, 1, 1], [], []>} : vector<8x8xf32>, vector<8x128xf32>, vector<8x128xf32> -> vector<8x128xf32>
    %80 = arith.addf %76, %79 : vector<8x128xf32>
    %c0_40 = arith.constant 0 : index
    %c0_41 = arith.constant 0 : index
    %81 = vector.load %arg6[%c0_40, %c0_41] : memref<8x1xf32, #tpu.memory_space<vmem>>, vector<8x1xf32>
    %82 = vector.broadcast %81 : vector<8x1xf32> to vector<8x128xf32>
    %83 = arith.addf %80, %82 : vector<8x128xf32>
    %cst_42 = arith.constant 0.000000e+00 : f32
    %84 = vector.broadcast %cst_42 : f32 to vector<8x128xf32>
    %85 = arith.cmpf oge, %83, %84 : vector<8x128xf32>
    %cst_43 = arith.constant 0.00999999977 : f32
    %86 = vector.broadcast %cst_43 : f32 to vector<8x128xf32>
    %87 = arith.mulf %86, %83 : vector<8x128xf32>
    %88 = arith.select %85, %83, %87 : vector<8x128xi1>, vector<8x128xf32>
    %c0_44 = arith.constant 0 : index
    %c0_45 = arith.constant 0 : index
    %89 = vector.load %arg7[%c0_44, %c0_45] : memref<8x1xf32, #tpu.memory_space<vmem>>, vector<8x1xf32>
    %90 = vector.broadcast %89 : vector<8x1xf32> to vector<8x128xf32>
    %91 = vector.broadcast %3 : vector<1x128xf32> to vector<8x128xf32>
    %92 = arith.mulf %90, %91 : vector<8x128xf32>
    %c0_46 = arith.constant 0 : index
    %c0_47 = arith.constant 0 : index
    %93 = vector.load %arg8[%c0_46, %c0_47] : memref<8x1xf32, #tpu.memory_space<vmem>>, vector<8x1xf32>
    %94 = vector.broadcast %93 : vector<8x1xf32> to vector<8x128xf32>
    %95 = arith.addf %92, %94 : vector<8x128xf32>
    %96 = arith.addf %88, %95 : vector<8x128xf32>
    %cst_48 = arith.constant 0.000000e+00 : f32
    %97 = vector.broadcast %cst_48 : f32 to vector<8x128xf32>
    %98 = arith.cmpf oge, %96, %97 : vector<8x128xf32>
    %cst_49 = arith.constant 0.00999999977 : f32
    %99 = vector.broadcast %cst_49 : f32 to vector<8x128xf32>
    %100 = arith.mulf %99, %96 : vector<8x128xf32>
    %101 = arith.select %98, %96, %100 : vector<8x128xi1>, vector<8x128xf32>
    %c0_50 = arith.constant 0 : index
    %c0_51 = arith.constant 0 : index
    %c0_52 = arith.constant 0 : index
    %102 = vector.load %arg9[%c0_50, %c0_51, %c0_52] : memref<3x8x8xf32, #tpu.memory_space<vmem>>, vector<1x8x8xf32>
    %103 = vector.shape_cast %102 : vector<1x8x8xf32> to vector<8x8xf32>
    %c4_i32_53 = arith.constant 4 : i32
    %104 = vector.broadcast %c4_i32_53 : i32 to vector<1x128xi32>
    %105 = arith.cmpi sge, %20, %104 : vector<1x128xi32>
    %c4_i32_54 = arith.constant 4 : i32
    %106 = tpu.dynamic_rotate %101 by %c4_i32_54 dim 1 : vector<8x128xf32>, i32 -> vector<8x128xf32>
    %cst_55 = arith.constant 0.000000e+00 : f32
    %107 = vector.shape_cast %105 : vector<1x128xi1> to vector<1x128xi1>
    %108 = vector.broadcast %107 : vector<1x128xi1> to vector<8x128xi1>
    %109 = vector.broadcast %cst_55 : f32 to vector<8x128xf32>
    %110 = arith.select %108, %106, %109 : vector<8x128xi1>, vector<8x128xf32>
    %cst_56 = arith.constant dense<0.000000e+00> : vector<8x128xf32>
    %111 = tpu.matmul %103, %110, %cst_56 {dimension_numbers = #tpu.dot_dimension_numbers<[1], [0], [0], [1], [0, 0, 1, 1], [], []>} : vector<8x8xf32>, vector<8x128xf32>, vector<8x128xf32> -> vector<8x128xf32>
    %c1_57 = arith.constant 1 : index
    %c0_58 = arith.constant 0 : index
    %c0_59 = arith.constant 0 : index
    %112 = vector.load %arg9[%c1_57, %c0_58, %c0_59] : memref<3x8x8xf32, #tpu.memory_space<vmem>>, vector<1x8x8xf32>
    %113 = vector.shape_cast %112 : vector<1x8x8xf32> to vector<8x8xf32>
    %c2_i32 = arith.constant 2 : i32
    %114 = vector.broadcast %c2_i32 : i32 to vector<1x128xi32>
    %115 = arith.cmpi sge, %20, %114 : vector<1x128xi32>
    %c2_i32_60 = arith.constant 2 : i32
    %116 = tpu.dynamic_rotate %101 by %c2_i32_60 dim 1 : vector<8x128xf32>, i32 -> vector<8x128xf32>
    %cst_61 = arith.constant 0.000000e+00 : f32
    %117 = vector.shape_cast %115 : vector<1x128xi1> to vector<1x128xi1>
    %118 = vector.broadcast %117 : vector<1x128xi1> to vector<8x128xi1>
    %119 = vector.broadcast %cst_61 : f32 to vector<8x128xf32>
    %120 = arith.select %118, %116, %119 : vector<8x128xi1>, vector<8x128xf32>
    %cst_62 = arith.constant dense<0.000000e+00> : vector<8x128xf32>
    %121 = tpu.matmul %113, %120, %cst_62 {dimension_numbers = #tpu.dot_dimension_numbers<[1], [0], [0], [1], [0, 0, 1, 1], [], []>} : vector<8x8xf32>, vector<8x128xf32>, vector<8x128xf32> -> vector<8x128xf32>
    %122 = arith.addf %111, %121 : vector<8x128xf32>
    %c2_63 = arith.constant 2 : index
    %c0_64 = arith.constant 0 : index
    %c0_65 = arith.constant 0 : index
    %123 = vector.load %arg9[%c2_63, %c0_64, %c0_65] : memref<3x8x8xf32, #tpu.memory_space<vmem>>, vector<1x8x8xf32>
    %124 = vector.shape_cast %123 : vector<1x8x8xf32> to vector<8x8xf32>
    %cst_66 = arith.constant dense<0.000000e+00> : vector<8x128xf32>
    %125 = tpu.matmul %124, %101, %cst_66 {dimension_numbers = #tpu.dot_dimension_numbers<[1], [0], [0], [1], [0, 0, 1, 1], [], []>} : vector<8x8xf32>, vector<8x128xf32>, vector<8x128xf32> -> vector<8x128xf32>
    %126 = arith.addf %122, %125 : vector<8x128xf32>
    %c0_67 = arith.constant 0 : index
    %c0_68 = arith.constant 0 : index
    %127 = vector.load %arg10[%c0_67, %c0_68] : memref<8x1xf32, #tpu.memory_space<vmem>>, vector<8x1xf32>
    %128 = vector.broadcast %127 : vector<8x1xf32> to vector<8x128xf32>
    %129 = arith.addf %126, %128 : vector<8x128xf32>
    %cst_69 = arith.constant 0.000000e+00 : f32
    %130 = vector.broadcast %cst_69 : f32 to vector<8x128xf32>
    %131 = arith.cmpf oge, %129, %130 : vector<8x128xf32>
    %cst_70 = arith.constant 0.00999999977 : f32
    %132 = vector.broadcast %cst_70 : f32 to vector<8x128xf32>
    %133 = arith.mulf %132, %129 : vector<8x128xf32>
    %134 = arith.select %131, %129, %133 : vector<8x128xi1>, vector<8x128xf32>
    %c0_71 = arith.constant 0 : index
    %c0_72 = arith.constant 0 : index
    %c0_73 = arith.constant 0 : index
    %135 = vector.load %arg11[%c0_71, %c0_72, %c0_73] : memref<3x8x8xf32, #tpu.memory_space<vmem>>, vector<1x8x8xf32>
    %136 = vector.shape_cast %135 : vector<1x8x8xf32> to vector<8x8xf32>
    %c4_i32_74 = arith.constant 4 : i32
    %137 = vector.broadcast %c4_i32_74 : i32 to vector<1x128xi32>
    %138 = arith.cmpi sge, %20, %137 : vector<1x128xi32>
    %c4_i32_75 = arith.constant 4 : i32
    %139 = tpu.dynamic_rotate %134 by %c4_i32_75 dim 1 : vector<8x128xf32>, i32 -> vector<8x128xf32>
    %cst_76 = arith.constant 0.000000e+00 : f32
    %140 = vector.shape_cast %138 : vector<1x128xi1> to vector<1x128xi1>
    %141 = vector.broadcast %140 : vector<1x128xi1> to vector<8x128xi1>
    %142 = vector.broadcast %cst_76 : f32 to vector<8x128xf32>
    %143 = arith.select %141, %139, %142 : vector<8x128xi1>, vector<8x128xf32>
    %cst_77 = arith.constant dense<0.000000e+00> : vector<8x128xf32>
    %144 = tpu.matmul %136, %143, %cst_77 {dimension_numbers = #tpu.dot_dimension_numbers<[1], [0], [0], [1], [0, 0, 1, 1], [], []>} : vector<8x8xf32>, vector<8x128xf32>, vector<8x128xf32> -> vector<8x128xf32>
    %c1_78 = arith.constant 1 : index
    %c0_79 = arith.constant 0 : index
    %c0_80 = arith.constant 0 : index
    %145 = vector.load %arg11[%c1_78, %c0_79, %c0_80] : memref<3x8x8xf32, #tpu.memory_space<vmem>>, vector<1x8x8xf32>
    %146 = vector.shape_cast %145 : vector<1x8x8xf32> to vector<8x8xf32>
    %c2_i32_81 = arith.constant 2 : i32
    %147 = vector.broadcast %c2_i32_81 : i32 to vector<1x128xi32>
    %148 = arith.cmpi sge, %20, %147 : vector<1x128xi32>
    %c2_i32_82 = arith.constant 2 : i32
    %149 = tpu.dynamic_rotate %134 by %c2_i32_82 dim 1 : vector<8x128xf32>, i32 -> vector<8x128xf32>
    %cst_83 = arith.constant 0.000000e+00 : f32
    %150 = vector.shape_cast %148 : vector<1x128xi1> to vector<1x128xi1>
    %151 = vector.broadcast %150 : vector<1x128xi1> to vector<8x128xi1>
    %152 = vector.broadcast %cst_83 : f32 to vector<8x128xf32>
    %153 = arith.select %151, %149, %152 : vector<8x128xi1>, vector<8x128xf32>
    %cst_84 = arith.constant dense<0.000000e+00> : vector<8x128xf32>
    %154 = tpu.matmul %146, %153, %cst_84 {dimension_numbers = #tpu.dot_dimension_numbers<[1], [0], [0], [1], [0, 0, 1, 1], [], []>} : vector<8x8xf32>, vector<8x128xf32>, vector<8x128xf32> -> vector<8x128xf32>
    %155 = arith.addf %144, %154 : vector<8x128xf32>
    %c2_85 = arith.constant 2 : index
    %c0_86 = arith.constant 0 : index
    %c0_87 = arith.constant 0 : index
    %156 = vector.load %arg11[%c2_85, %c0_86, %c0_87] : memref<3x8x8xf32, #tpu.memory_space<vmem>>, vector<1x8x8xf32>
    %157 = vector.shape_cast %156 : vector<1x8x8xf32> to vector<8x8xf32>
    %cst_88 = arith.constant dense<0.000000e+00> : vector<8x128xf32>
    %158 = tpu.matmul %157, %134, %cst_88 {dimension_numbers = #tpu.dot_dimension_numbers<[1], [0], [0], [1], [0, 0, 1, 1], [], []>} : vector<8x8xf32>, vector<8x128xf32>, vector<8x128xf32> -> vector<8x128xf32>
    %159 = arith.addf %155, %158 : vector<8x128xf32>
    %c0_89 = arith.constant 0 : index
    %c0_90 = arith.constant 0 : index
    %160 = vector.load %arg12[%c0_89, %c0_90] : memref<8x1xf32, #tpu.memory_space<vmem>>, vector<8x1xf32>
    %161 = vector.broadcast %160 : vector<8x1xf32> to vector<8x128xf32>
    %162 = arith.addf %159, %161 : vector<8x128xf32>
    %cst_91 = arith.constant 0.000000e+00 : f32
    %163 = vector.broadcast %cst_91 : f32 to vector<8x128xf32>
    %164 = arith.cmpf oge, %162, %163 : vector<8x128xf32>
    %cst_92 = arith.constant 0.00999999977 : f32
    %165 = vector.broadcast %cst_92 : f32 to vector<8x128xf32>
    %166 = arith.mulf %165, %162 : vector<8x128xf32>
    %167 = arith.select %164, %162, %166 : vector<8x128xi1>, vector<8x128xf32>
    %168 = arith.addf %167, %101 : vector<8x128xf32>
    %cst_93 = arith.constant 0.000000e+00 : f32
    %169 = vector.broadcast %cst_93 : f32 to vector<8x128xf32>
    %170 = arith.cmpf oge, %168, %169 : vector<8x128xf32>
    %cst_94 = arith.constant 0.00999999977 : f32
    %171 = vector.broadcast %cst_94 : f32 to vector<8x128xf32>
    %172 = arith.mulf %171, %168 : vector<8x128xf32>
    %173 = arith.select %170, %168, %172 : vector<8x128xi1>, vector<8x128xf32>
    %c0_95 = arith.constant 0 : index
    %c0_96 = arith.constant 0 : index
    %c0_97 = arith.constant 0 : index
    %174 = vector.load %arg13[%c0_95, %c0_96, %c0_97] : memref<3x4x8xf32, #tpu.memory_space<vmem>>, vector<1x4x8xf32>
    %175 = vector.shape_cast %174 : vector<1x4x8xf32> to vector<4x8xf32>
    %c2_i32_98 = arith.constant 2 : i32
    %176 = vector.broadcast %c2_i32_98 : i32 to vector<1x128xi32>
    %177 = arith.cmpi sge, %20, %176 : vector<1x128xi32>
    %c2_i32_99 = arith.constant 2 : i32
    %178 = tpu.dynamic_rotate %173 by %c2_i32_99 dim 1 : vector<8x128xf32>, i32 -> vector<8x128xf32>
    %cst_100 = arith.constant 0.000000e+00 : f32
    %179 = vector.shape_cast %177 : vector<1x128xi1> to vector<1x128xi1>
    %180 = vector.broadcast %179 : vector<1x128xi1> to vector<8x128xi1>
    %181 = vector.broadcast %cst_100 : f32 to vector<8x128xf32>
    %182 = arith.select %180, %178, %181 : vector<8x128xi1>, vector<8x128xf32>
    %cst_101 = arith.constant dense<0.000000e+00> : vector<4x128xf32>
    %183 = tpu.matmul %175, %182, %cst_101 {dimension_numbers = #tpu.dot_dimension_numbers<[1], [0], [0], [1], [0, 0, 1, 1], [], []>} : vector<4x8xf32>, vector<8x128xf32>, vector<4x128xf32> -> vector<4x128xf32>
    %c1_102 = arith.constant 1 : index
    %c0_103 = arith.constant 0 : index
    %c0_104 = arith.constant 0 : index
    %184 = vector.load %arg13[%c1_102, %c0_103, %c0_104] : memref<3x4x8xf32, #tpu.memory_space<vmem>>, vector<1x4x8xf32>
    %185 = vector.shape_cast %184 : vector<1x4x8xf32> to vector<4x8xf32>
    %c1_i32_105 = arith.constant 1 : i32
    %186 = vector.broadcast %c1_i32_105 : i32 to vector<1x128xi32>
    %187 = arith.cmpi sge, %20, %186 : vector<1x128xi32>
    %c1_i32_106 = arith.constant 1 : i32
    %188 = tpu.dynamic_rotate %173 by %c1_i32_106 dim 1 : vector<8x128xf32>, i32 -> vector<8x128xf32>
    %cst_107 = arith.constant 0.000000e+00 : f32
    %189 = vector.shape_cast %187 : vector<1x128xi1> to vector<1x128xi1>
    %190 = vector.broadcast %189 : vector<1x128xi1> to vector<8x128xi1>
    %191 = vector.broadcast %cst_107 : f32 to vector<8x128xf32>
    %192 = arith.select %190, %188, %191 : vector<8x128xi1>, vector<8x128xf32>
    %cst_108 = arith.constant dense<0.000000e+00> : vector<4x128xf32>
    %193 = tpu.matmul %185, %192, %cst_108 {dimension_numbers = #tpu.dot_dimension_numbers<[1], [0], [0], [1], [0, 0, 1, 1], [], []>} : vector<4x8xf32>, vector<8x128xf32>, vector<4x128xf32> -> vector<4x128xf32>
    %194 = arith.addf %183, %193 : vector<4x128xf32>
    %c2_109 = arith.constant 2 : index
    %c0_110 = arith.constant 0 : index
    %c0_111 = arith.constant 0 : index
    %195 = vector.load %arg13[%c2_109, %c0_110, %c0_111] : memref<3x4x8xf32, #tpu.memory_space<vmem>>, vector<1x4x8xf32>
    %196 = vector.shape_cast %195 : vector<1x4x8xf32> to vector<4x8xf32>
    %cst_112 = arith.constant dense<0.000000e+00> : vector<4x128xf32>
    %197 = tpu.matmul %196, %173, %cst_112 {dimension_numbers = #tpu.dot_dimension_numbers<[1], [0], [0], [1], [0, 0, 1, 1], [], []>} : vector<4x8xf32>, vector<8x128xf32>, vector<4x128xf32> -> vector<4x128xf32>
    %198 = arith.addf %194, %197 : vector<4x128xf32>
    %c0_113 = arith.constant 0 : index
    %c0_114 = arith.constant 0 : index
    %199 = vector.load %arg14[%c0_113, %c0_114] : memref<4x1xf32, #tpu.memory_space<vmem>>, vector<4x1xf32>
    %200 = vector.broadcast %199 : vector<4x1xf32> to vector<4x128xf32>
    %201 = arith.addf %198, %200 : vector<4x128xf32>
    %cst_115 = arith.constant 0.000000e+00 : f32
    %202 = vector.broadcast %cst_115 : f32 to vector<4x128xf32>
    %203 = arith.cmpf oge, %201, %202 : vector<4x128xf32>
    %cst_116 = arith.constant 0.00999999977 : f32
    %204 = vector.broadcast %cst_116 : f32 to vector<4x128xf32>
    %205 = arith.mulf %204, %201 : vector<4x128xf32>
    %206 = arith.select %203, %201, %205 : vector<4x128xi1>, vector<4x128xf32>
    %c0_117 = arith.constant 0 : index
    %c0_118 = arith.constant 0 : index
    %c0_119 = arith.constant 0 : index
    %207 = vector.load %arg15[%c0_117, %c0_118, %c0_119] : memref<3x4x4xf32, #tpu.memory_space<vmem>>, vector<1x4x4xf32>
    %208 = vector.shape_cast %207 : vector<1x4x4xf32> to vector<4x4xf32>
    %c2_i32_120 = arith.constant 2 : i32
    %209 = vector.broadcast %c2_i32_120 : i32 to vector<1x128xi32>
    %210 = arith.cmpi sge, %20, %209 : vector<1x128xi32>
    %c2_i32_121 = arith.constant 2 : i32
    %211 = tpu.dynamic_rotate %206 by %c2_i32_121 dim 1 : vector<4x128xf32>, i32 -> vector<4x128xf32>
    %cst_122 = arith.constant 0.000000e+00 : f32
    %212 = vector.shape_cast %210 : vector<1x128xi1> to vector<1x128xi1>
    %213 = vector.broadcast %212 : vector<1x128xi1> to vector<4x128xi1>
    %214 = vector.broadcast %cst_122 : f32 to vector<4x128xf32>
    %215 = arith.select %213, %211, %214 : vector<4x128xi1>, vector<4x128xf32>
    %cst_123 = arith.constant dense<0.000000e+00> : vector<4x128xf32>
    %216 = tpu.matmul %208, %215, %cst_123 {dimension_numbers = #tpu.dot_dimension_numbers<[1], [0], [0], [1], [0, 0, 1, 1], [], []>} : vector<4x4xf32>, vector<4x128xf32>, vector<4x128xf32> -> vector<4x128xf32>
    %c1_124 = arith.constant 1 : index
    %c0_125 = arith.constant 0 : index
    %c0_126 = arith.constant 0 : index
    %217 = vector.load %arg15[%c1_124, %c0_125, %c0_126] : memref<3x4x4xf32, #tpu.memory_space<vmem>>, vector<1x4x4xf32>
    %218 = vector.shape_cast %217 : vector<1x4x4xf32> to vector<4x4xf32>
    %c1_i32_127 = arith.constant 1 : i32
    %219 = vector.broadcast %c1_i32_127 : i32 to vector<1x128xi32>
    %220 = arith.cmpi sge, %20, %219 : vector<1x128xi32>
    %c1_i32_128 = arith.constant 1 : i32
    %221 = tpu.dynamic_rotate %206 by %c1_i32_128 dim 1 : vector<4x128xf32>, i32 -> vector<4x128xf32>
    %cst_129 = arith.constant 0.000000e+00 : f32
    %222 = vector.shape_cast %220 : vector<1x128xi1> to vector<1x128xi1>
    %223 = vector.broadcast %222 : vector<1x128xi1> to vector<4x128xi1>
    %224 = vector.broadcast %cst_129 : f32 to vector<4x128xf32>
    %225 = arith.select %223, %221, %224 : vector<4x128xi1>, vector<4x128xf32>
    %cst_130 = arith.constant dense<0.000000e+00> : vector<4x128xf32>
    %226 = tpu.matmul %218, %225, %cst_130 {dimension_numbers = #tpu.dot_dimension_numbers<[1], [0], [0], [1], [0, 0, 1, 1], [], []>} : vector<4x4xf32>, vector<4x128xf32>, vector<4x128xf32> -> vector<4x128xf32>
    %227 = arith.addf %216, %226 : vector<4x128xf32>
    %c2_131 = arith.constant 2 : index
    %c0_132 = arith.constant 0 : index
    %c0_133 = arith.constant 0 : index
    %228 = vector.load %arg15[%c2_131, %c0_132, %c0_133] : memref<3x4x4xf32, #tpu.memory_space<vmem>>, vector<1x4x4xf32>
    %229 = vector.shape_cast %228 : vector<1x4x4xf32> to vector<4x4xf32>
    %cst_134 = arith.constant dense<0.000000e+00> : vector<4x128xf32>
    %230 = tpu.matmul %229, %206, %cst_134 {dimension_numbers = #tpu.dot_dimension_numbers<[1], [0], [0], [1], [0, 0, 1, 1], [], []>} : vector<4x4xf32>, vector<4x128xf32>, vector<4x128xf32> -> vector<4x128xf32>
    %231 = arith.addf %227, %230 : vector<4x128xf32>
    %c0_135 = arith.constant 0 : index
    %c0_136 = arith.constant 0 : index
    %232 = vector.load %arg16[%c0_135, %c0_136] : memref<4x1xf32, #tpu.memory_space<vmem>>, vector<4x1xf32>
    %233 = vector.broadcast %232 : vector<4x1xf32> to vector<4x128xf32>
    %234 = arith.addf %231, %233 : vector<4x128xf32>
    %cst_137 = arith.constant 0.000000e+00 : f32
    %235 = vector.broadcast %cst_137 : f32 to vector<4x128xf32>
    %236 = arith.cmpf oge, %234, %235 : vector<4x128xf32>
    %cst_138 = arith.constant 0.00999999977 : f32
    %237 = vector.broadcast %cst_138 : f32 to vector<4x128xf32>
    %238 = arith.mulf %237, %234 : vector<4x128xf32>
    %239 = arith.select %236, %234, %238 : vector<4x128xi1>, vector<4x128xf32>
    %c0_139 = arith.constant 0 : index
    %c0_140 = arith.constant 0 : index
    %240 = vector.load %arg17[%c0_139, %c0_140] : memref<4x8xf32, #tpu.memory_space<vmem>>, vector<4x8xf32>
    %cst_141 = arith.constant dense<0.000000e+00> : vector<4x128xf32>
    %241 = tpu.matmul %240, %173, %cst_141 {dimension_numbers = #tpu.dot_dimension_numbers<[1], [0], [0], [1], [0, 0, 1, 1], [], []>} : vector<4x8xf32>, vector<8x128xf32>, vector<4x128xf32> -> vector<4x128xf32>
    %c0_142 = arith.constant 0 : index
    %c0_143 = arith.constant 0 : index
    %242 = vector.load %arg18[%c0_142, %c0_143] : memref<4x1xf32, #tpu.memory_space<vmem>>, vector<4x1xf32>
    %243 = vector.broadcast %242 : vector<4x1xf32> to vector<4x128xf32>
    %244 = arith.addf %241, %243 : vector<4x128xf32>
    %245 = arith.addf %239, %244 : vector<4x128xf32>
    %cst_144 = arith.constant 0.000000e+00 : f32
    %246 = vector.broadcast %cst_144 : f32 to vector<4x128xf32>
    %247 = arith.cmpf oge, %245, %246 : vector<4x128xf32>
    %cst_145 = arith.constant 0.00999999977 : f32
    %248 = vector.broadcast %cst_145 : f32 to vector<4x128xf32>
    %249 = arith.mulf %248, %245 : vector<4x128xf32>
    %250 = arith.select %247, %245, %249 : vector<4x128xi1>, vector<4x128xf32>
    %251 = vector.shape_cast %250 : vector<4x128xf32> to vector<1x4x128xf32>
    %c0_146 = arith.constant 0 : index
    %c0_147 = arith.constant 0 : index
    %c0_148 = arith.constant 0 : index
    %252 = vector.load %arg19[%c0_146, %c0_147, %c0_148] : memref<1x4x128xf32, #tpu.memory_space<vmem>>, vector<1x4x128xf32>
    tpu.vector_store %arg19[%c0_146, %c0_147, %c0_148], %251 {strides = array<i32>} : memref<1x4x128xf32, #tpu.memory_space<vmem>>, vector<1x4x128xf32>,
    return
  }
  func.func @transform_0(%arg0: i32) -> (i32, i32, i32) {
    %c0_i32 = arith.constant 0 : i32
    %c0_i32_0 = arith.constant 0 : i32
    %c0_i32_1 = arith.constant 0 : i32
    return %arg0, %c0_i32, %c0_i32_0 : i32, i32, i32
  }
  func.func @transform_1(%arg0: i32) -> (i32, i32) {
    %c0_i32 = arith.constant 0 : i32
    %c0_i32_0 = arith.constant 0 : i32
    %c0_i32_1 = arith.constant 0 : i32
    return %c0_i32, %c0_i32_0 : i32, i32
  }
  func.func @transform_2(%arg0: i32) -> (i32, i32, i32) {
    %c0_i32 = arith.constant 0 : i32
    %c0_i32_0 = arith.constant 0 : i32
    %c0_i32_1 = arith.constant 0 : i32
    %c0_i32_2 = arith.constant 0 : i32
    return %c0_i32, %c0_i32_0, %c0_i32_1 : i32, i32, i32
  }
  func.func @transform_3(%arg0: i32) -> (i32, i32) {
    %c0_i32 = arith.constant 0 : i32
    %c0_i32_0 = arith.constant 0 : i32
    %c0_i32_1 = arith.constant 0 : i32
    return %c0_i32, %c0_i32_0 : i32, i32
  }
  func.func @transform_4(%arg0: i32) -> (i32, i32, i32) {
    %c0_i32 = arith.constant 0 : i32
    %c0_i32_0 = arith.constant 0 : i32
    %c0_i32_1 = arith.constant 0 : i32
    %c0_i32_2 = arith.constant 0 : i32
    return %c0_i32, %c0_i32_0, %c0_i32_1 : i32, i32, i32
  }
  func.func @transform_5(%arg0: i32) -> (i32, i32) {
    %c0_i32 = arith.constant 0 : i32
    %c0_i32_0 = arith.constant 0 : i32
    %c0_i32_1 = arith.constant 0 : i32
    return %c0_i32, %c0_i32_0 : i32, i32
  }
  func.func @transform_6(%arg0: i32) -> (i32, i32) {
    %c0_i32 = arith.constant 0 : i32
    %c0_i32_0 = arith.constant 0 : i32
    %c0_i32_1 = arith.constant 0 : i32
    return %c0_i32, %c0_i32_0 : i32, i32
  }
  func.func @transform_7(%arg0: i32) -> (i32, i32) {
    %c0_i32 = arith.constant 0 : i32
    %c0_i32_0 = arith.constant 0 : i32
    %c0_i32_1 = arith.constant 0 : i32
    return %c0_i32, %c0_i32_0 : i32, i32
  }
  func.func @transform_8(%arg0: i32) -> (i32, i32, i32) {
    %c0_i32 = arith.constant 0 : i32
    %c0_i32_0 = arith.constant 0 : i32
    %c0_i32_1 = arith.constant 0 : i32
    %c0_i32_2 = arith.constant 0 : i32
    return %c0_i32, %c0_i32_0, %c0_i32_1 : i32, i32, i32
  }
  func.func @transform_9(%arg0: i32) -> (i32, i32) {
    %c0_i32 = arith.constant 0 : i32
    %c0_i32_0 = arith.constant 0 : i32
    %c0_i32_1 = arith.constant 0 : i32
    return %c0_i32, %c0_i32_0 : i32, i32
  }
  func.func @transform_10(%arg0: i32) -> (i32, i32, i32) {
    %c0_i32 = arith.constant 0 : i32
    %c0_i32_0 = arith.constant 0 : i32
    %c0_i32_1 = arith.constant 0 : i32
    %c0_i32_2 = arith.constant 0 : i32
    return %c0_i32, %c0_i32_0, %c0_i32_1 : i32, i32, i32
  }
  func.func @transform_11(%arg0: i32) -> (i32, i32) {
    %c0_i32 = arith.constant 0 : i32
    %c0_i32_0 = arith.constant 0 : i32
    %c0_i32_1 = arith.constant 0 : i32
    return %c0_i32, %c0_i32_0 : i32, i32
  }
  func.func @transform_12(%arg0: i32) -> (i32, i32, i32) {
    %c0_i32 = arith.constant 0 : i32
    %c0_i32_0 = arith.constant 0 : i32
    %c0_i32_1 = arith.constant 0 : i32
    %c0_i32_2 = arith.constant 0 : i32
    return %c0_i32, %c0_i32_0, %c0_i32_1 : i32, i32, i32
  }
  func.func @transform_13(%arg0: i32) -> (i32, i32) {
    %c0_i32 = arith.constant 0 : i32
    %c0_i32_0 = arith.constant 0 : i32
    %c0_i32_1 = arith.constant 0 : i32
    return %c0_i32, %c0_i32_0 : i32, i32
  }
  func.func @transform_14(%arg0: i32) -> (i32, i32, i32) {
    %c0_i32 = arith.constant 0 : i32
    %c0_i32_0 = arith.constant 0 : i32
    %c0_i32_1 = arith.constant 0 : i32
    %c0_i32_2 = arith.constant 0 : i32
    return %c0_i32, %c0_i32_0, %c0_i32_1 : i32, i32, i32
  }
  func.func @transform_15(%arg0: i32) -> (i32, i32) {
    %c0_i32 = arith.constant 0 : i32
    %c0_i32_0 = arith.constant 0 : i32
    %c0_i32_1 = arith.constant 0 : i32
    return %c0_i32, %c0_i32_0 : i32, i32
  }
  func.func @transform_16(%arg0: i32) -> (i32, i32) {
    %c0_i32 = arith.constant 0 : i32
    %c0_i32_0 = arith.constant 0 : i32
    %c0_i32_1 = arith.constant 0 : i32
    return %c0_i32, %c0_i32_0 : i32, i32
  }
  func.func @transform_17(%arg0: i32) -> (i32, i32) {
    %c0_i32 = arith.constant 0 : i32
    %c0_i32_0 = arith.constant 0 : i32
    %c0_i32_1 = arith.constant 0 : i32
    return %c0_i32, %c0_i32_0 : i32, i32
  }
  func.func @transform_18(%arg0: i32) -> (i32, i32, i32) {
    %c0_i32 = arith.constant 0 : i32
    %c0_i32_0 = arith.constant 0 : i32
    %c0_i32_1 = arith.constant 0 : i32
    return %arg0, %c0_i32, %c0_i32_0 : i32, i32, i32
  }
}

</mosaic_0001>

<bundles_post_ra>
// kernel: tpu_custom_call.1
= control target key start
LH: loop header
LB: loop body
LE: loop exit
PB: predicated region body
PF: predicated region fallthrough
CT: control target
= control target key end

     0   :  { %s2176_s0 = inlined_call_operand.vmem [shape: f32[1,1,64], index: 0, kind: input, shape index: {}]   ;;  %s2177_s1 = inlined_call_operand.vmem [shape: f32[64,128], index: 1, kind: input, shape index: {}]   ;;  %s2178_s2 = inlined_call_operand.vmem [shape: f32[3,8,1], index: 2, kind: input, shape index: {}]   ;;  %s2179_s3 = inlined_call_operand.vmem [shape: f32[8,1], index: 3, kind: input, shape index: {}]   ;;  %s2180_s4 = inlined_call_operand.vmem [shape: f32[3,8,8], index: 4, kind: input, shape index: {}]   ;;  %s2181_s5 = inlined_call_operand.vmem [shape: f32[8,1], index: 5, kind: input, shape index: {}]   ;;  %s2182_s6 = inlined_call_operand.vmem [shape: f32[8,1], index: 6, kind: input, shape index: {}]   ;;  %s2183_s7 = inlined_call_operand.vmem [shape: f32[8,1], index: 7, kind: input, shape index: {}]   ;;  %s2184_s8 = inlined_call_operand.vmem [shape: f32[3,8,8], index: 8, kind: input, shape index: {}]   ;;  %s2185_s9 = inlined_call_operand.vmem [shape: f32[8,1], index: 9, kind: input, shape index: {}]   ;;  %s2186_s10 = inlined_call_operand.hbm [shape: f32[3,8,8], index: 10, kind: input, shape index: {}]   ;;  %s2187_s11 = inlined_call_operand.vmem [shape: f32[8,1], index: 11, kind: input, shape index: {}]   ;;  %s2188_s12 = inlined_call_operand.vmem [shape: f32[3,4,8], index: 12, kind: input, shape index: {}]   ;;  %s2189_s13 = inlined_call_operand.vmem [shape: f32[4,1], index: 13, kind: input, shape index: {}]   ;;  %s2190_s14 = inlined_call_operand.vmem [shape: f32[3,4,4], index: 14, kind: input, shape index: {}]   ;;  %s2191_s15 = inlined_call_operand.vmem [shape: f32[4,1], index: 15, kind: input, shape index: {}]   ;;  %s2192_s16 = inlined_call_operand.vmem [shape: f32[4,8], index: 16, kind: input, shape index: {}]   ;;  %s2193_s17 = inlined_call_operand.vmem [shape: f32[4,1], index: 17, kind: input, shape index: {}]   ;;  %s2194_s18 = inlined_call_operand.hbm [shape: f32[1,4,128], index: 18, kind: output, shape index: {}]  }
   0x1   :  { %2197 = sst [smem:[#allocation8_spill]] %s2176_s0 }
   0x2   :  { %2198 = sst [smem:[#allocation9_spill]] %s2177_s1 }
   0x3   :  { %2199 = sst [smem:[#allocation10_spill]] %s2178_s2 }
   0x4   :  { %23 = vsyncpa [#allocation3], 0 }
   0x5   :  { %24 = vsyncpa [#allocation4], 0  ;;  %s1826_s27 = smov [#allocation2]   ;;  %s1778_s0 = scalar_lea.hbm %s2186_s10, 384 }
   0x6   :  { %s50_s28 = sshll.u32 %s1826_s27, 4  ;;  %p1779_p0 = scmp.ne.s32.totalorder %s2186_s10, %s1778_s0  ;;  %s51_s28 = int_to_ptr.vmem [resolvable:$true] %s50_s28 }
   0x7   :  { %p1782_p1 = scmp.lt.u32.totalorder %s1778_s0, %s2186_s10 }
   0x9   :  { %p1784_p2 = pnand %p1782_p1, %p1779_p0 }
   0xb   :  { %1787 = shalt.err (!%p1784_p2)
}
   0xc   :  { %s1788_s22 = scalar_lea.vmem %s51_s28, 384  ;;  %p1793_p4 = scmp.lt.s32.totalorder %s51_s28, %s51_s28 }
   0xd   :  { %p1789_p3 = scmp.ne.s32.totalorder %s51_s28, %s1788_s22  ;;  %p1794_p5 = scmp.lt.s32.totalorder %s1788_s22, %s1788_s22 }
   0xf   :  { %p1795_p6 = por %p1794_p5, %p1793_p4 }
  0x11   :  { %p1796_p7 = pnand %p1795_p6, %p1789_p3 }
  0x13   :  { %1799 = shalt.err (!%p1796_p7)
}
  0x14   :  { %s1827_s2 = smov 128   ;;  %s1828_s23 = smov 8  }
  0x15   :  { %56 = dma.hbm_to_vmem [thread:$0]  %s2186_s10, 384, %s51_s28, [#allocation3], %s1827_s2, %s1827_s2, %s1828_s23  }
  0x16   :  { %1822 = dma.done.wait [#allocation3], 384  }
  0x17   :  { %1823 = vsyncadd [#allocation3], 4294966912  ;;  %v1829_v0 = vmov 0.0|0.0   ;;  %vm1830_vm0 = vmmov 0   ;;  %v1831_v1 = vmov 0.0   ;;  %v1832_v2 = vmov 0  }
  0x18   :  { %1753 = vmatprep.subr.bf16.mxu0 %v1829_v0  ;;  %1670 = vmatprep.mubr.msk.f32.mxu0 %vm1830_vm0, %v1831_v1  ;;  %s2200_s10 = sld [smem:[#allocation9_spill]]  ;;  %s2201_s22 = sld [smem:[#allocation10_spill]]  ;;  %vm83_vm1 = vcmask 523264   ;;  %v216_v21 = vld [vmem:[%s2179_s3] sm:$0xff]  ;;  %v157_v22 = vlaneseq  ;;  %v1578_v49 = vld [vmem:[%s2180_s4 + $0x8] sm:$0xff]  ;;  %vm239_vm5 = vcmask 64512  }
  0x19   :  { %1777 = vset.pattern.permute.xlu1 %v1832_v2  ;;  %1776 = vset.pattern.permute.xlu0 %v1832_v2  ;;  %s2202_s24 = sld [smem:[#allocation8_spill]]  ;;  %v472_v46 = vld [vmem:[%s2182_s6] sm:$0xff]  ;;  %v1583_v53 = vld [vmem:[%s2180_s4 + $0x10] sm:$0xff]  ;;  %s1834_s20 = smov 2   ;;  %vm1236_vm14 = vcmask 1043456   ;;  %vm1232_vm15 = vcmask 31744  }
  0x1a   :  { %1673 = vmatprep.subr.mxu1 %v1831_v1  ;;  %1675 = vmatprep.mubr.msk.f32.mxu1 %vm1830_vm0, %v1831_v1  ;;  %v158_v24 = vand.u32 127, %v157_v22  ;;  %v182_v28 = vshrl.u32 %v157_v22, 7  ;;  %v462_v47 = vld [vmem:[%s2181_s5] sm:$0xff] }
  0x1b   :  { %v479_v48 = vld [vmem:[%s2183_s7] sm:$0xff] }
  0x1c   :  { %v1994_v25 = vand.u32 31, %v158_v24  ;;  %v183_v33 = vsub.s32 0, %v182_v28  ;;  %v226_v52 = vld [vmem:[%s2180_s4] sm:$0xff] }
  0x1e   :  { %v75_v3 = vld [vmem:[%s2200_s10] sm:$0xff]  ;;  %v76_v4 = vld [vmem:[%s2200_s10 + $0x8] sm:$0xff]  ;;  %v77_v5 = vld [vmem:[%s2200_s10 + $0x10] sm:$0xff]  ;;  %vm188_vm2 = vcmp.ge.s32.totalorder %v1994_v25, 4  ;;  %vm172_vm3 = vcmp.ge.s32.totalorder %v1994_v25, 8  ;;  %vm496_vm8 = vcmp.ge.s32.totalorder %v1994_v25, 2 }
  0x1f   :  { %v1754_v6 = vpack.c.bf16 %v76_v4, %v75_v3  ;;  %v78_v7 = vld [vmem:[%s2200_s10 + $0x18] sm:$0xff]  ;;  %v1577_v9 = vld [vmem:[%s2201_s22 + $0x10] sm:$0xff]  ;;  %v171_v10 = vld [vmem:[%s2201_s22] sm:$0xff]  ;;  %vm985_vm12 = vcmp.ge.s32.totalorder %v1994_v25, 1 }
  0x20   :  { %v1757_v8 = vpack.c.bf16 %v78_v7, %v77_v5  ;;  %v79_v11 = vld [vmem:[%s2200_s10 + $0x20] sm:$0xff]  ;;  %v80_v12 = vld [vmem:[%s2200_s10 + $0x28] sm:$0xff]  ;;  %207 = vperm.xlu1 %1777, %v1577_v9   ;;  %178 = vperm.xlu0 %1776, %v171_v10   ;;  %v81_v15 = vld [vmem:[%s2200_s10 + $0x30] sm:$0xff] }
  0x21   :  { %1755 = vmatpush3.bf16.msra.mxu0 %v1754_v6  ;;  %v1576_v13 = vld [vmem:[%s2201_s22 + $0x8] sm:$0xff]  ;;  %v1760_v14 = vpack.c.bf16 %v80_v12, %v79_v11  ;;  %v82_v16 = vld [vmem:[%s2200_s10 + $0x38] sm:$0xff]  ;;  %v74_v18 = vld [vmem:[%s2202_s24] sm:$0x1]  ;;  %s1833_s22 = smov 4  }
  0x22   :  { %1756 = vmatprep.subr.bf16.mxu0 %v1829_v0  ;;  %v1763_v17 = vpack.c.bf16 %v82_v16, %v81_v15  ;;  %v1590_v10 = vld [vmem:[%s2184_s8 + $0x10] sm:$0xff]  ;;  %v724_v11 = vld [vmem:[%s2185_s9] sm:$0xff]  ;;  %v1585_v12 = vld [vmem:[%s2184_s8 + $0x8] sm:$0xff] }
  0x23   :  { %v490_v15 = vld [vmem:[%s2184_s8] sm:$0xff] }
  0x24   :  { %194 = vperm.xlu0 %1776, %v1576_v13   ;;  %v1475_v25 = vld [vmem:[%s2192_s16] sm:$0xf] }
  0x25   :  { %1758 = vmatpush3.bf16.msra.mxu0 %v1757_v8 }
  0x26   :  { %1759 = vmatprep.subr.bf16.mxu0 %v1829_v0 }
  0x29   :  { %1761 = vmatpush3.bf16.msra.mxu0 %v1760_v14 }
  0x2a   :  { %1762 = vmatprep.subr.bf16.mxu0 %v1829_v0 }
  0x2d   :  { %1764 = vmatpush3.bf16.msra.mxu0 %v1763_v17 }
  0x2e   :  { %1698 = vmatprep.subr.mxu0 %v1831_v1 }
  0x30   :  { %1671 = vmatmul.mubr.msk.f32.vlgmr.msra.gmra.mrb[0].mxu0 %vm83_vm1, %v74_v18 }
  0x31   :  { %1700 = vmatprep.mubr.msk.f32.mxu0 %vm1830_vm0, %v1831_v1 }
  0x9f   :  { %v179_v23 = vpop.permute.xlu0 %178  ;;  %v208_v27 = vpop.permute.xlu1 %207 }
  0xa3   :  { %v195_v26 = vpop.permute.xlu0 %194 }
 0x103   :  { %v153_v19 = vpop.f32.mrb[0].mxu0 }
 0x104   :  { %189 = vrot.lane.b32.xlu0 %v153_v19, %s1833_s22  ;;  %173 = vrot.lane.b32.xlu1 %v153_v19, %s1828_s23  ;;  %v1672_v20 = vpop.f32.mrb[1].mxu0  ;;  %v213_v38 = vrot.slane %v153_v19, %v183_v33 }
 0x106   :  { %v214_v40 = vmul.f32 %v213_v38, %v208_v27 }
 0x108   :  { %219 = vperm.xlu1 %1777, %v216_v21  }
 0x176   :  { %v190_v29 = vpop.permute.xlu0 %189  ;;  %v174_v30 = vpop.permute.xlu1 %173 }
 0x177   :  { %v191_v31 = vsel %vm188_vm2, %v190_v29, 0.0  ;;  %v175_v32 = vsel %vm172_vm3, %v174_v30, 0.0  ;;  %v965_v29 = vld [vmem:[%s2187_s11] sm:$0xff]  ;;  %v739_v30 = vld [vmem:[#allocation2 + $0x8] sm:$0xff]  ;;  %s1835_s11 = smov 1  }
 0x178   :  { %v200_v34 = vrot.slane %v191_v31, %v183_v33  ;;  %v184_v35 = vrot.slane %v175_v32, %v183_v33  ;;  %v734_v31 = vld [vmem:[#allocation2] sm:$0xff] }
 0x17a   :  { %v201_v36 = vmul.f32 %v200_v34, %v195_v26  ;;  %v185_v37 = vmul.f32 %v184_v35, %v179_v23  ;;  %v890_v34 = vld [vmem:[#allocation2 + $0x10] sm:$0xff] }
 0x17c   :  { %v202_v39 = vadd.f32 %v201_v36, %v185_v37 }
 0x17e   :  { %v215_v41 = vadd.f32 %v214_v40, %v202_v39 }
 0x187   :  { %v220_v42 = vpop.permute.xlu1 %219 }
 0x188   :  { %v222_v43 = vadd.f32 %v220_v42, %v215_v41 }
 0x18a   :  { %v224_v44 = vmul.f32 0.01, %v222_v43  ;;  %vm223_vm4 = vcmp.ge.f32.partialorder %v222_v43, 0.0 }
 0x18c   :  { %v225_v45 = vsel %vm223_vm4, %v222_v43, %v224_v44 }
 0x18d   :  { %227 = vrot.lane.b32.xlu1 %v225_v45, %s1828_s23  ;;  %234 = vrot.lane.b32.xlu0 %v225_v45, %s1833_s22 }
 0x191   :  { %475 = vperm.xlu1 %1777, %v472_v46   ;;  %465 = vperm.xlu0 %1776, %v462_v47  }
 0x195   :  { %482 = vperm.xlu0 %1776, %v479_v48  }
 0x1ff   :  { %v235_v50 = vpop.permute.xlu0 %234  ;;  %v228_v51 = vpop.permute.xlu1 %227 }
 0x200   :  { %1674 = vmatpush3.msk.msra.mxu1 %vm188_vm2, %v235_v50  ;;  %v1213_v50 = vld [vmem:[%s2189_s13] sm:$0xf] }
 0x201   :  { %1676 = vmatmul.mubr.msk.f32.vlgmr.msra.gmra.mrb[0].mxu1 %vm239_vm5, %v1578_v49  ;;  %1678 = vmatprep.subr.mxu1 %v1831_v1 }
 0x202   :  { %1679 = vmatpush3.msk.msra.mxu1 %vm172_vm3, %v228_v51  ;;  %1680 = vmatprep.mubr.msk.f32.mxu1 %vm1830_vm0, %v1831_v1  ;;  %v1597_v51 = vld [vmem:[%s2188_s12 + $0x4] sm:$0xf] }
 0x203   :  { %1683 = vmatprep.subr.mxu1 %v1831_v1 }
 0x205   :  { %1681 = vmatmul.mubr.msk.f32.vlgmr.msra.gmra.mrb[2].mxu1 %vm239_vm5, %v226_v52  ;;  %v979_v52 = vld [vmem:[%s2188_s12] sm:$0xf] }
 0x206   :  { %1684 = vmatpush3.msra.mxu1 %v225_v45  ;;  %1685 = vmatprep.mubr.msk.f32.mxu1 %vm1830_vm0, %v1831_v1 }
 0x207   :  { %1688 = vmatprep.subr.mxu1 %v1831_v1 }
 0x209   :  { %1686 = vmatmul.mubr.msk.f32.vlgmr.msra.gmra.mrb[4].mxu1 %vm239_vm5, %v1583_v53 }
 0x20a   :  { %1690 = vmatprep.mubr.msk.f32.mxu1 %vm1830_vm0, %v1831_v1 }
 0x210   :  { %v466_v57 = vpop.permute.xlu0 %465  ;;  %v476_v61 = vpop.permute.xlu1 %475 }
 0x211   :  { %v478_v3 = vmul.f32 %v476_v61, %v213_v38 }
 0x214   :  { %v483_v0 = vpop.permute.xlu0 %482 }
 0x215   :  { %v485_v5 = vadd.f32 %v483_v0, %v478_v3 }
 0x2d4   :  { %v309_v54 = vpop.f32.mrb[0].mxu1 }
 0x2d5   :  { %v1677_v55 = vpop.f32.mrb[1].mxu1 }
 0x2d6   :  { %v1602_v55 = vld [vmem:[%s2188_s12 + $0x8] sm:$0xf] }
 0x2d8   :  { %v382_v56 = vpop.f32.mrb[2].mxu1 }
 0x2d9   :  { %v383_v58 = vadd.f32 %v382_v56, %v309_v54  ;;  %v1682_v59 = vpop.f32.mrb[3].mxu1 }
 0x2dc   :  { %v457_v60 = vpop.f32.mrb[4].mxu1 }
 0x2dd   :  { %v461_v62 = vadd.f32 %v457_v60, %v383_v58  ;;  %v1687_v63 = vpop.f32.mrb[5].mxu1 }
 0x2df   :  { %v468_v2 = vadd.f32 %v466_v57, %v461_v62 }
 0x2e1   :  { %vm469_vm6 = vcmp.ge.f32.partialorder %v468_v2, 0.0  ;;  %v470_v4 = vmul.f32 0.01, %v468_v2 }
 0x2e3   :  { %v471_v6 = vsel %vm469_vm6, %v468_v2, %v470_v4 }
 0x2e4   :  { %v486_v7 = vadd.f32 %v485_v5, %v471_v6  ;;  %v1476_v5 = vld [vmem:[%s2193_s17] sm:$0xf] }
 0x2e5   :  { %v1465_v6 = vld [vmem:[%s2191_s15] sm:$0xf] }
 0x2e6   :  { %vm487_vm7 = vcmp.ge.f32.partialorder %v486_v7, 0.0  ;;  %v488_v8 = vmul.f32 0.01, %v486_v7 }
 0x2e8   :  { %v2038_v9 = vsel %vm487_vm7, %v486_v7, %v488_v8 }
 0x2e9   :  { %491 = vrot.lane.b32.xlu0 %v2038_v9, %s1833_s22  ;;  %497 = vrot.lane.b32.xlu1 %v2038_v9, %s1834_s20 }
 0x2ea   :  { %1699 = vmatpush3.msra.mxu0 %v2038_v9 }
 0x2eb   :  { %1701 = vmatmul.mubr.msk.f32.vlgmr.msra.gmra.mrb[2].mxu0 %vm239_vm5, %v1590_v10  ;;  %1708 = vmatprep.subr.mxu0 %v1831_v1  ;;  %v1223_v10 = vld [vmem:[%s2190_s14] sm:$0xf] }
 0x2ec   :  { %1710 = vmatprep.mubr.msk.f32.mxu0 %vm1830_vm0, %v1831_v1 }
 0x2ed   :  { %727 = vperm.xlu1 %1777, %v724_v11  }
 0x35b   :  { %v498_v13 = vpop.permute.xlu1 %497  ;;  %v492_v14 = vpop.permute.xlu0 %491 }
 0x35c   :  { %1689 = vmatpush3.msk.msra.mxu1 %vm496_vm8, %v498_v13  ;;  %v1609_v13 = vld [vmem:[%s2190_s14 + $0x8] sm:$0xf] }
 0x35d   :  { %1691 = vmatmul.mubr.msk.f32.vlgmr.msra.gmra.mrb[6].mxu1 %vm239_vm5, %v1585_v12  ;;  %1693 = vmatprep.subr.mxu1 %v1831_v1 }
 0x35e   :  { %1694 = vmatpush3.msk.msra.mxu1 %vm188_vm2, %v492_v14  ;;  %1695 = vmatprep.mubr.msk.f32.mxu1 %vm1830_vm0, %v1831_v1 }
 0x35f   :  { %1703 = vmatprep.subr.mxu1 %v1831_v1 }
 0x361   :  { %1696 = vmatmul.mubr.msk.f32.vlgmr.msra.gmra.mrb[8].mxu1 %vm239_vm5, %v490_v15 }
 0x362   :  { %1705 = vmatprep.mubr.msk.f32.mxu1 %vm1830_vm0, %v1831_v1 }
 0x36c   :  { %v728_v24 = vpop.permute.xlu1 %727 }
 0x3be   :  { %v719_v16 = vpop.f32.mrb[2].mxu0 }
 0x3bf   :  { %v1702_v17 = vpop.f32.mrb[3].mxu0 }
 0x430   :  { %v571_v18 = vpop.f32.mrb[6].mxu1 }
 0x431   :  { %v1692_v19 = vpop.f32.mrb[7].mxu1 }
 0x434   :  { %v644_v20 = vpop.f32.mrb[8].mxu1 }
 0x435   :  { %v645_v21 = vadd.f32 %v644_v20, %v571_v18  ;;  %v1697_v22 = vpop.f32.mrb[9].mxu1 }
 0x437   :  { %v723_v23 = vadd.f32 %v719_v16, %v645_v21 }
 0x439   :  { %v730_v26 = vadd.f32 %v728_v24, %v723_v23 }
 0x43b   :  { %vm731_vm9 = vcmp.ge.f32.partialorder %v730_v26, 0.0  ;;  %v732_v27 = vmul.f32 0.01, %v730_v26 }
 0x43d   :  { %v733_v28 = vsel %vm731_vm9, %v730_v26, %v732_v27 }
 0x43e   :  { %735 = vrot.lane.b32.xlu1 %v733_v28, %s1833_s22  ;;  %740 = vrot.lane.b32.xlu0 %v733_v28, %s1834_s20 }
 0x442   :  { %968 = vperm.xlu0 %1776, %v965_v29  }
 0x4b0   :  { %v736_v32 = vpop.permute.xlu1 %735  ;;  %v741_v33 = vpop.permute.xlu0 %740 }
 0x4b1   :  { %1704 = vmatpush3.msk.msra.mxu1 %vm496_vm8, %v741_v33  ;;  %1709 = vmatpush3.msk.msra.mxu0 %vm188_vm2, %v736_v32 }
 0x4b2   :  { %1706 = vmatmul.mubr.msk.f32.vlgmr.msra.gmra.mrb[10].mxu1 %vm239_vm5, %v739_v30  ;;  %1711 = vmatmul.mubr.msk.f32.vlgmr.msra.gmra.mrb[4].mxu0 %vm239_vm5, %v734_v31 }
 0x4b3   :  { %1713 = vmatprep.subr.mxu1 %v1831_v1  ;;  %1715 = vmatprep.mubr.msk.f32.mxu1 %vm1830_vm0, %v1831_v1 }
 0x4b4   :  { %1714 = vmatpush3.msra.mxu1 %v733_v28  ;;  %1718 = vmatprep.subr.mxu0 %v1831_v1 }
 0x4b5   :  { %1723 = vmatprep.subr.mxu1 %v1831_v1  ;;  %1720 = vmatprep.mubr.msk.f32.mxu0 %vm1830_vm0, %v1831_v1 }
 0x4b6   :  { %1716 = vmatmul.mubr.msk.f32.vlgmr.msra.gmra.mrb[12].mxu1 %vm239_vm5, %v890_v34 }
 0x4b7   :  { %1725 = vmatprep.mubr.msk.f32.mxu1 %vm1830_vm0, %v1831_v1 }
 0x4c1   :  { %v969_v43 = vpop.permute.xlu0 %968 }
 0x585   :  { %v812_v35 = vpop.f32.mrb[10].mxu1  ;;  %v885_v36 = vpop.f32.mrb[4].mxu0 }
 0x586   :  { %v886_v37 = vadd.f32 %v885_v36, %v812_v35  ;;  %v1707_v38 = vpop.f32.mrb[11].mxu1  ;;  %v1712_v39 = vpop.f32.mrb[5].mxu0 }
 0x589   :  { %v960_v40 = vpop.f32.mrb[12].mxu1 }
 0x58a   :  { %v964_v41 = vadd.f32 %v960_v40, %v886_v37  ;;  %v1717_v42 = vpop.f32.mrb[13].mxu1 }
 0x58c   :  { %v971_v44 = vadd.f32 %v969_v43, %v964_v41 }
 0x58e   :  { %vm972_vm10 = vcmp.ge.f32.partialorder %v971_v44, 0.0  ;;  %v973_v45 = vmul.f32 0.01, %v971_v44 }
 0x590   :  { %v974_v46 = vsel %vm972_vm10, %v971_v44, %v973_v45 }
 0x591   :  { %v975_v47 = vadd.f32 %v974_v46, %v2038_v9  ;;  %v1604_v9 = vld [vmem:[%s2190_s14 + $0x4] sm:$0xf]  ;;  %s1836_s14 = smov [#allocation5]  }
 0x592   :  { %s1566_s16 = sshll.u32 %s1836_s14, 4  ;;  %s1567_s16 = int_to_ptr.vmem [resolvable:$true] %s1566_s16 }
 0x593   :  { %vm976_vm11 = vcmp.ge.f32.partialorder %v975_v47, 0.0  ;;  %v977_v48 = vmul.f32 0.01, %v975_v47  ;;  %s1800_s2 = scalar_lea.vmem %s1567_s16, 64  ;;  %p1805_p9 = scmp.lt.s32.totalorder %s1567_s16, %s1567_s16 }
 0x594   :  { %p1801_p8 = scmp.ne.s32.totalorder %s1567_s16, %s1800_s2  ;;  %p1806_p10 = scmp.lt.s32.totalorder %s1800_s2, %s1800_s2 }
 0x595   :  { %v978_v49 = vsel %vm976_vm11, %v975_v47, %v977_v48 }
 0x596   :  { %980 = vrot.lane.b32.xlu0 %v978_v49, %s1834_s20  ;;  %986 = vrot.lane.b32.xlu1 %v978_v49, %s1835_s11  ;;  %p1807_p11 = por %p1806_p10, %p1805_p9 }
 0x598   :  { %p1808_p12 = pnand %p1807_p11, %p1801_p8 }
 0x59a   :  { %1216 = vperm.xlu1 %1777, %v1213_v50  }
 0x608   :  { %v981_v53 = vpop.permute.xlu0 %980  ;;  %v987_v54 = vpop.permute.xlu1 %986 }
 0x609   :  { %1719 = vmatpush3.msk.msra.mxu0 %vm985_vm12, %v987_v54  ;;  %1724 = vmatpush3.msk.msra.mxu1 %vm496_vm8, %v981_v53 }
 0x60a   :  { %1721 = vmatmul.mubr.msk.f32.vlgmr.msra.gmra.mrb[6].mxu0 %vm239_vm5, %v1597_v51  ;;  %1726 = vmatmul.mubr.msk.f32.vlgmr.msra.gmra.mrb[14].mxu1 %vm239_vm5, %v979_v52 }
 0x60b   :  { %1728 = vmatprep.subr.mxu0 %v1831_v1  ;;  %1730 = vmatprep.mubr.msk.f32.mxu0 %vm1830_vm0, %v1831_v1 }
 0x60c   :  { %1729 = vmatpush3.msra.mxu0 %v978_v49  ;;  %1733 = vmatprep.subr.mxu1 %v1831_v1 }
 0x60d   :  { %1738 = vmatprep.subr.mxu0 %v1831_v1  ;;  %1735 = vmatprep.mubr.msk.f32.mxu1 %vm1830_vm0, %v1831_v1 }
 0x60e   :  { %1731 = vmatmul.mubr.msk.f32.vlgmr.msra.gmra.mrb[8].mxu0 %vm239_vm5, %v1602_v55 }
 0x60f   :  { %1740 = vmatprep.mubr.msk.f32.mxu0 %vm1830_vm0, %v1831_v1 }
 0x619   :  { %v1217_v0 = vpop.permute.xlu1 %1216 }
 0x6dd   :  { %v1060_v56 = vpop.f32.mrb[6].mxu0  ;;  %v1133_v57 = vpop.f32.mrb[14].mxu1 }
 0x6de   :  { %v1134_v58 = vadd.f32 %v1133_v57, %v1060_v56  ;;  %v1722_v59 = vpop.f32.mrb[7].mxu0  ;;  %v1727_v60 = vpop.f32.mrb[15].mxu1 }
 0x6e1   :  { %v1208_v61 = vpop.f32.mrb[8].mxu0 }
 0x6e2   :  { %v1212_v62 = vadd.f32 %v1208_v61, %v1134_v58  ;;  %v1732_v63 = vpop.f32.mrb[9].mxu0 }
 0x6e4   :  { %v1219_v2 = vadd.f32 %v1217_v0, %v1212_v62 }
 0x6e6   :  { %vm1220_vm13 = vcmp.ge.f32.partialorder %v1219_v2, 0.0  ;;  %v1221_v3 = vmul.f32 0.01, %v1219_v2 }
 0x6e8   :  { %v1222_v4 = vsel %vm1220_vm13, %v1219_v2, %v1221_v3 }
 0x6e9   :  { %1224 = vrot.lane.b32.xlu1 %v1222_v4, %s1834_s20  ;;  %1229 = vrot.lane.b32.xlu0 %v1222_v4, %s1835_s11 }
 0x6ed   :  { %1479 = vperm.xlu1 %1777, %v1476_v5   ;;  %1468 = vperm.xlu0 %1776, %v1465_v6  }
 0x75b   :  { %v1225_v7 = vpop.permute.xlu1 %1224  ;;  %v1230_v8 = vpop.permute.xlu0 %1229 }
 0x75c   :  { %v1226_v11 = vsel %vm496_vm8, %v1225_v7, 0.0  ;;  %v1231_v12 = vsel %vm985_vm12, %v1230_v8, 0.0 }
 0x75d   :  { %1734 = vmatpush3.msk.msra.mxu1 %vm1236_vm14, %v1231_v12  ;;  %1739 = vmatpush3.msk.msra.mxu0 %vm1236_vm14, %v1226_v11 }
 0x75e   :  { %1736 = vmatmul.mubr.msk.f32.vlgmr.msra.gmra.mrb[16].mxu1 %vm1232_vm15, %v1604_v9  ;;  %1741 = vmatmul.mubr.msk.f32.vlgmr.msra.gmra.mrb[10].mxu0 %vm1232_vm15, %v1223_v10 }
 0x75f   :  { %1743 = vmatprep.subr.mxu1 %v1831_v1  ;;  %1748 = vmatprep.subr.mxu0 %v1831_v1 }
 0x760   :  { %1744 = vmatpush3.msk.msra.mxu1 %vm1236_vm14, %v1222_v4  ;;  %1749 = vmatpush3.msra.mxu0 %v978_v49 }
 0x761   :  { %1745 = vmatprep.mubr.msk.f32.mxu1 %vm1830_vm0, %v1831_v1  ;;  %1750 = vmatprep.mubr.msk.f32.mxu0 %vm1830_vm0, %v1831_v1 }
 0x762   :  { %1746 = vmatmul.mubr.msk.f32.vlgmr.msra.gmra.mrb[18].mxu1 %vm1232_vm15, %v1609_v13  ;;  %1751 = vmatmul.mubr.msk.f32.vlgmr.msra.gmra.mrb[12].mxu0 %vm239_vm5, %v1475_v25 }
 0x76c   :  { %v1469_v24 = vpop.permute.xlu0 %1468  ;;  %v1480_v27 = vpop.permute.xlu1 %1479 }
 0x831   :  { %v1306_v14 = vpop.f32.mrb[16].mxu1  ;;  %v1382_v15 = vpop.f32.mrb[10].mxu0 }
 0x832   :  { %v1383_v16 = vadd.f32 %v1382_v15, %v1306_v14  ;;  %v1737_v17 = vpop.f32.mrb[17].mxu1  ;;  %v1742_v18 = vpop.f32.mrb[11].mxu0 }
 0x835   :  { %v1460_v19 = vpop.f32.mrb[18].mxu1  ;;  %v1551_v20 = vpop.f32.mrb[12].mxu0 }
 0x836   :  { %v1464_v21 = vadd.f32 %v1460_v19, %v1383_v16  ;;  %v1747_v22 = vpop.f32.mrb[19].mxu1  ;;  %v1752_v23 = vpop.f32.mrb[13].mxu0  ;;  %v1552_v1 = vadd.f32 %v1551_v20, %v1480_v27 }
 0x838   :  { %v1471_v26 = vadd.f32 %v1469_v24, %v1464_v21 }
 0x83a   :  { %v1473_v28 = vmul.f32 0.01, %v1471_v26  ;;  %vm1472_vm1 = vcmp.ge.f32.partialorder %v1471_v26, 0.0 }
 0x83c   :  { %v1474_v29 = vsel %vm1472_vm1, %v1471_v26, %v1473_v28 }
 0x83d   :  { %v1555_v30 = vadd.f32 %v1552_v1, %v1474_v29 }
 0x83f   :  { %v1557_v31 = vmul.f32 0.01, %v1555_v30  ;;  %vm1556_vm0 = vcmp.ge.f32.partialorder %v1555_v30, 0.0 }
 0x841   :  { %v1558_v32 = vsel %vm1556_vm0, %v1555_v30, %v1557_v31 }
 0x842   :  { %1559 = vst [vmem:[#allocation5] sm:$0xf] %v1558_v32 }
 0x843   :  { %1811 = shalt.err (!%p1808_p12)
}
 0x844   :  { %s1812_s9 = scalar_lea.hbm %s2194_s18, 64 }
 0x845   :  { %p1813_p13 = scmp.ne.s32.totalorder %s2194_s18, %s1812_s9  ;;  %p1816_p0 = scmp.lt.u32.totalorder %s1812_s9, %s2194_s18 }
 0x847   :  { %p1818_p1 = pnand %p1816_p0, %p1813_p13 }
 0x849   :  { %1821 = shalt.err (!%p1818_p1)
}
 0x84a   :  { %1569 = dma.vmem_to_hbm [thread:$0]  %s1567_s16, 64, %s2194_s18, [#allocation4]  }
 0x84b   :  { %1824 = dma.done.wait [#allocation4], 64  }
 0x84c   :  { %1825 = vsyncadd [#allocation4], 4294967232 }
 0x84d   :  { %1573 = vsyncpa [#allocation3], 1 }
 0x84e   :  { %1574 = vsyncpa [#allocation4], 1 }

</bundles_post_ra>
